<compile_context>
chip_gen: v6e
topology: v6e:2x2x1
jax: 0.10.0
libtpu: 0.0.40
codegen_flags: <defaults>
</compile_context>

<pallas_src>
import jax
import jax.numpy as jnp
from jax.experimental import pallas as pl
from jax.experimental.pallas import tpu as pltpu

NUM_CH = 10  # conv1 output channels == fc1 input features


def simple_cnn_kernel(wmid_ref, cb_ref, fcw_ref, fcb_ref, x_ref, o_ref):
    # wmid_ref: (10,) SMEM   center tap of conv1 weight, W[c, 0, 1]
    # cb_ref:   (10,) SMEM   conv1 bias
    # fcw_ref:  (10,) SMEM   fc1 weight row
    # fcb_ref:  (1,)  SMEM   fc1 bias
    # x_ref:    (1, TB) VMEM inputs, batch on the lane axis
    # o_ref:    (1, TB) VMEM sigmoid outputs, batch on the lane axis
    x = x_ref[...]                                            # (1, TB) f32
    acc = jnp.full_like(x, fcb_ref[0])                        # start from fc1 bias
    for c in range(NUM_CH):                                   # unrolled VPU fma chain
        h = jnp.maximum(x * wmid_ref[c] + cb_ref[c], 0.0)     # conv center tap + ReLU
        acc = acc + h * fcw_ref[c]                            # fc1 accumulate
    # sigmoid: exp goes to the EUP slot; one full-precision divide per vreg
    # keeps f32 accuracy and is negligible for this memory-bound kernel.
    o_ref[...] = 1.0 / (1.0 + jnp.exp(-acc))


def simple_cnn_forward(x, conv_w, conv_b, fc_w, fc_b, *, tb=2048):
    """x: (B, 1) or (B,) f32; conv_w: (10,1,3); conv_b: (10,); fc_w: (1,10); fc_b: (1,)."""
    x = jnp.asarray(x, jnp.float32)
    B = x.shape[0]
    x2 = x.reshape(B, -1)
    assert x2.shape[1] == 1, "fc1=Linear(10,1) implies sequence length 1"
    xT = x2.reshape(1, B)                                     # batch -> lanes

    # Conv1d(1,10,k=3,pad=1) on a length-1 sequence: only the center tap sees data.
    w_mid = conv_w[:, 0, 1].astype(jnp.float32)               # (10,)
    cb = conv_b.reshape(NUM_CH).astype(jnp.float32)           # (10,)
    fcw = fc_w.reshape(NUM_CH).astype(jnp.float32)            # (10,)
    fcb = fc_b.reshape(1).astype(jnp.float32)                 # (1,)

    # Batch tile: the full array if it fits one tile, else a multiple of 128
    # lanes.  TB=2048 keeps double-buffered in+out tiles at ~32 KiB, far under
    # the 16/32/32 MiB scoped-VMEM defaults on v5e/v6e/v7x.
    if B <= tb:
        tb = B
    else:
        tb = max(128, (tb // 128) * 128)
    grid = (pl.cdiv(B, tb),)

    smem = pl.BlockSpec(memory_space=pltpu.MemorySpace.SMEM)
    out = pl.pallas_call(
        simple_cnn_kernel,
        out_shape=jax.ShapeDtypeStruct((1, B), jnp.float32),
        grid=grid,
        in_specs=[smem, smem, smem, smem,
                  pl.BlockSpec((1, tb), lambda i: (0, i))],
        out_specs=pl.BlockSpec((1, tb), lambda i: (0, i)),
        compiler_params=pltpu.CompilerParams(
            dimension_semantics=("parallel",)),
    )(w_mid, cb, fcw, fcb, xT)
    return out.reshape(B, 1)


def reference_forward(x, conv_w, conv_b, fc_w, fc_b):
    # Pure-JAX reference of the PyTorch forward (for a sanity check).
    xpad = jnp.pad(x, ((0, 0), (1, 1)))                       # (B, 3)
    conv = xpad @ conv_w[:, 0, :].T + conv_b[None, :]         # (B, 10)
    h = jnp.maximum(conv, 0.0)
    y = h @ fc_w.T + fc_b[None, :]                            # (B, 1)
    return jax.nn.sigmoid(y)


if __name__ == "__main__":
    key = jax.random.PRNGKey(0)
    k_x, k_cw, k_cb, k_fw, k_fb = jax.random.split(key, 5)

    B = 8
    x = jax.random.normal(k_x, (B, 1), dtype=jnp.float32)

    # Deterministic parameter init (PyTorch-style uniform bounds, fixed seed).
    conv_bound = 1.0 / (1 * 3) ** 0.5
    conv_w = jax.random.uniform(k_cw, (10, 1, 3), jnp.float32, -conv_bound, conv_bound)
    conv_b = jax.random.uniform(k_cb, (10,), jnp.float32, -conv_bound, conv_bound)
    fc_bound = 1.0 / 10 ** 0.5
    fc_w = jax.random.uniform(k_fw, (1, 10), jnp.float32, -fc_bound, fc_bound)
    fc_b = jax.random.uniform(k_fb, (1,), jnp.float32, -fc_bound, fc_bound)

    out = simple_cnn_forward(x, conv_w, conv_b, fc_w, fc_b)
    out = jax.block_until_ready(out)

    ref = reference_forward(x, conv_w, conv_b, fc_w, fc_b)
    assert out.shape == (B, 1)
    assert jnp.allclose(out, ref, atol=1e-5, rtol=1e-5)

    print("KERNEL_OK")
</pallas_src>

<mosaic_0001>
module attributes {stable_mosaic.version = 11 : i64} {
  func.func @simple_cnn_kernel(%arg0: i32, %arg1: memref<10xf32, #tpu.memory_space<smem>>, %arg2: memref<10xf32, #tpu.memory_space<smem>>, %arg3: memref<10xf32, #tpu.memory_space<smem>>, %arg4: memref<1xf32, #tpu.memory_space<smem>>, %arg5: memref<1x8xf32, #tpu.memory_space<vmem>>, %arg6: memref<1x8xf32, #tpu.memory_space<vmem>>) attributes {dimension_semantics = [#tpu.dimension_semantics<parallel>], iteration_bounds = array<i64: 1>, scalar_prefetch = 0 : i64, scratch_operands = 0 : i64, tpu.core_type = #tpu.core_type<tc>, window_params = [{transform_indices = @transform_0, window_bounds = array<i64: 10>}, {transform_indices = @transform_1, window_bounds = array<i64: 10>}, {transform_indices = @transform_2, window_bounds = array<i64: 10>}, {transform_indices = @transform_3, window_bounds = array<i64: 1>}, {transform_indices = @transform_4, window_bounds = array<i64: 1, 8>}, {transform_indices = @transform_5, window_bounds = array<i64: 1, 8>}]} {
    %c0 = arith.constant 0 : index
    %c0_0 = arith.constant 0 : index
    %0 = vector.load %arg5[%c0, %c0_0] : memref<1x8xf32, #tpu.memory_space<vmem>>, vector<1x8xf32>
    %c0_1 = arith.constant 0 : index
    %1 = memref.load %arg4[%c0_1] : memref<1xf32, #tpu.memory_space<smem>>
    %2 = vector.broadcast %1 : f32 to vector<1x8xf32>
    %c0_2 = arith.constant 0 : index
    %3 = memref.load %arg1[%c0_2] : memref<10xf32, #tpu.memory_space<smem>>
    %4 = vector.broadcast %3 : f32 to vector<1x8xf32>
    %5 = arith.mulf %0, %4 : vector<1x8xf32>
    %c0_3 = arith.constant 0 : index
    %6 = memref.load %arg2[%c0_3] : memref<10xf32, #tpu.memory_space<smem>>
    %7 = vector.broadcast %6 : f32 to vector<1x8xf32>
    %8 = arith.addf %5, %7 : vector<1x8xf32>
    %cst = arith.constant 0.000000e+00 : f32
    %9 = vector.broadcast %cst : f32 to vector<1x8xf32>
    %10 = arith.maximumf %8, %9 : vector<1x8xf32>
    %c0_4 = arith.constant 0 : index
    %11 = memref.load %arg3[%c0_4] : memref<10xf32, #tpu.memory_space<smem>>
    %12 = vector.broadcast %11 : f32 to vector<1x8xf32>
    %13 = arith.mulf %10, %12 : vector<1x8xf32>
    %14 = arith.addf %2, %13 : vector<1x8xf32>
    %c1 = arith.constant 1 : index
    %15 = memref.load %arg1[%c1] : memref<10xf32, #tpu.memory_space<smem>>
    %16 = vector.broadcast %15 : f32 to vector<1x8xf32>
    %17 = arith.mulf %0, %16 : vector<1x8xf32>
    %c1_5 = arith.constant 1 : index
    %18 = memref.load %arg2[%c1_5] : memref<10xf32, #tpu.memory_space<smem>>
    %19 = vector.broadcast %18 : f32 to vector<1x8xf32>
    %20 = arith.addf %17, %19 : vector<1x8xf32>
    %cst_6 = arith.constant 0.000000e+00 : f32
    %21 = vector.broadcast %cst_6 : f32 to vector<1x8xf32>
    %22 = arith.maximumf %20, %21 : vector<1x8xf32>
    %c1_7 = arith.constant 1 : index
    %23 = memref.load %arg3[%c1_7] : memref<10xf32, #tpu.memory_space<smem>>
    %24 = vector.broadcast %23 : f32 to vector<1x8xf32>
    %25 = arith.mulf %22, %24 : vector<1x8xf32>
    %26 = arith.addf %14, %25 : vector<1x8xf32>
    %c2 = arith.constant 2 : index
    %27 = memref.load %arg1[%c2] : memref<10xf32, #tpu.memory_space<smem>>
    %28 = vector.broadcast %27 : f32 to vector<1x8xf32>
    %29 = arith.mulf %0, %28 : vector<1x8xf32>
    %c2_8 = arith.constant 2 : index
    %30 = memref.load %arg2[%c2_8] : memref<10xf32, #tpu.memory_space<smem>>
    %31 = vector.broadcast %30 : f32 to vector<1x8xf32>
    %32 = arith.addf %29, %31 : vector<1x8xf32>
    %cst_9 = arith.constant 0.000000e+00 : f32
    %33 = vector.broadcast %cst_9 : f32 to vector<1x8xf32>
    %34 = arith.maximumf %32, %33 : vector<1x8xf32>
    %c2_10 = arith.constant 2 : index
    %35 = memref.load %arg3[%c2_10] : memref<10xf32, #tpu.memory_space<smem>>
    %36 = vector.broadcast %35 : f32 to vector<1x8xf32>
    %37 = arith.mulf %34, %36 : vector<1x8xf32>
    %38 = arith.addf %26, %37 : vector<1x8xf32>
    %c3 = arith.constant 3 : index
    %39 = memref.load %arg1[%c3] : memref<10xf32, #tpu.memory_space<smem>>
    %40 = vector.broadcast %39 : f32 to vector<1x8xf32>
    %41 = arith.mulf %0, %40 : vector<1x8xf32>
    %c3_11 = arith.constant 3 : index
    %42 = memref.load %arg2[%c3_11] : memref<10xf32, #tpu.memory_space<smem>>
    %43 = vector.broadcast %42 : f32 to vector<1x8xf32>
    %44 = arith.addf %41, %43 : vector<1x8xf32>
    %cst_12 = arith.constant 0.000000e+00 : f32
    %45 = vector.broadcast %cst_12 : f32 to vector<1x8xf32>
    %46 = arith.maximumf %44, %45 : vector<1x8xf32>
    %c3_13 = arith.constant 3 : index
    %47 = memref.load %arg3[%c3_13] : memref<10xf32, #tpu.memory_space<smem>>
    %48 = vector.broadcast %47 : f32 to vector<1x8xf32>
    %49 = arith.mulf %46, %48 : vector<1x8xf32>
    %50 = arith.addf %38, %49 : vector<1x8xf32>
    %c4 = arith.constant 4 : index
    %51 = memref.load %arg1[%c4] : memref<10xf32, #tpu.memory_space<smem>>
    %52 = vector.broadcast %51 : f32 to vector<1x8xf32>
    %53 = arith.mulf %0, %52 : vector<1x8xf32>
    %c4_14 = arith.constant 4 : index
    %54 = memref.load %arg2[%c4_14] : memref<10xf32, #tpu.memory_space<smem>>
    %55 = vector.broadcast %54 : f32 to vector<1x8xf32>
    %56 = arith.addf %53, %55 : vector<1x8xf32>
    %cst_15 = arith.constant 0.000000e+00 : f32
    %57 = vector.broadcast %cst_15 : f32 to vector<1x8xf32>
    %58 = arith.maximumf %56, %57 : vector<1x8xf32>
    %c4_16 = arith.constant 4 : index
    %59 = memref.load %arg3[%c4_16] : memref<10xf32, #tpu.memory_space<smem>>
    %60 = vector.broadcast %59 : f32 to vector<1x8xf32>
    %61 = arith.mulf %58, %60 : vector<1x8xf32>
    %62 = arith.addf %50, %61 : vector<1x8xf32>
    %c5 = arith.constant 5 : index
    %63 = memref.load %arg1[%c5] : memref<10xf32, #tpu.memory_space<smem>>
    %64 = vector.broadcast %63 : f32 to vector<1x8xf32>
    %65 = arith.mulf %0, %64 : vector<1x8xf32>
    %c5_17 = arith.constant 5 : index
    %66 = memref.load %arg2[%c5_17] : memref<10xf32, #tpu.memory_space<smem>>
    %67 = vector.broadcast %66 : f32 to vector<1x8xf32>
    %68 = arith.addf %65, %67 : vector<1x8xf32>
    %cst_18 = arith.constant 0.000000e+00 : f32
    %69 = vector.broadcast %cst_18 : f32 to vector<1x8xf32>
    %70 = arith.maximumf %68, %69 : vector<1x8xf32>
    %c5_19 = arith.constant 5 : index
    %71 = memref.load %arg3[%c5_19] : memref<10xf32, #tpu.memory_space<smem>>
    %72 = vector.broadcast %71 : f32 to vector<1x8xf32>
    %73 = arith.mulf %70, %72 : vector<1x8xf32>
    %74 = arith.addf %62, %73 : vector<1x8xf32>
    %c6 = arith.constant 6 : index
    %75 = memref.load %arg1[%c6] : memref<10xf32, #tpu.memory_space<smem>>
    %76 = vector.broadcast %75 : f32 to vector<1x8xf32>
    %77 = arith.mulf %0, %76 : vector<1x8xf32>
    %c6_20 = arith.constant 6 : index
    %78 = memref.load %arg2[%c6_20] : memref<10xf32, #tpu.memory_space<smem>>
    %79 = vector.broadcast %78 : f32 to vector<1x8xf32>
    %80 = arith.addf %77, %79 : vector<1x8xf32>
    %cst_21 = arith.constant 0.000000e+00 : f32
    %81 = vector.broadcast %cst_21 : f32 to vector<1x8xf32>
    %82 = arith.maximumf %80, %81 : vector<1x8xf32>
    %c6_22 = arith.constant 6 : index
    %83 = memref.load %arg3[%c6_22] : memref<10xf32, #tpu.memory_space<smem>>
    %84 = vector.broadcast %83 : f32 to vector<1x8xf32>
    %85 = arith.mulf %82, %84 : vector<1x8xf32>
    %86 = arith.addf %74, %85 : vector<1x8xf32>
    %c7 = arith.constant 7 : index
    %87 = memref.load %arg1[%c7] : memref<10xf32, #tpu.memory_space<smem>>
    %88 = vector.broadcast %87 : f32 to vector<1x8xf32>
    %89 = arith.mulf %0, %88 : vector<1x8xf32>
    %c7_23 = arith.constant 7 : index
    %90 = memref.load %arg2[%c7_23] : memref<10xf32, #tpu.memory_space<smem>>
    %91 = vector.broadcast %90 : f32 to vector<1x8xf32>
    %92 = arith.addf %89, %91 : vector<1x8xf32>
    %cst_24 = arith.constant 0.000000e+00 : f32
    %93 = vector.broadcast %cst_24 : f32 to vector<1x8xf32>
    %94 = arith.maximumf %92, %93 : vector<1x8xf32>
    %c7_25 = arith.constant 7 : index
    %95 = memref.load %arg3[%c7_25] : memref<10xf32, #tpu.memory_space<smem>>
    %96 = vector.broadcast %95 : f32 to vector<1x8xf32>
    %97 = arith.mulf %94, %96 : vector<1x8xf32>
    %98 = arith.addf %86, %97 : vector<1x8xf32>
    %c8 = arith.constant 8 : index
    %99 = memref.load %arg1[%c8] : memref<10xf32, #tpu.memory_space<smem>>
    %100 = vector.broadcast %99 : f32 to vector<1x8xf32>
    %101 = arith.mulf %0, %100 : vector<1x8xf32>
    %c8_26 = arith.constant 8 : index
    %102 = memref.load %arg2[%c8_26] : memref<10xf32, #tpu.memory_space<smem>>
    %103 = vector.broadcast %102 : f32 to vector<1x8xf32>
    %104 = arith.addf %101, %103 : vector<1x8xf32>
    %cst_27 = arith.constant 0.000000e+00 : f32
    %105 = vector.broadcast %cst_27 : f32 to vector<1x8xf32>
    %106 = arith.maximumf %104, %105 : vector<1x8xf32>
    %c8_28 = arith.constant 8 : index
    %107 = memref.load %arg3[%c8_28] : memref<10xf32, #tpu.memory_space<smem>>
    %108 = vector.broadcast %107 : f32 to vector<1x8xf32>
    %109 = arith.mulf %106, %108 : vector<1x8xf32>
    %110 = arith.addf %98, %109 : vector<1x8xf32>
    %c9 = arith.constant 9 : index
    %111 = memref.load %arg1[%c9] : memref<10xf32, #tpu.memory_space<smem>>
    %112 = vector.broadcast %111 : f32 to vector<1x8xf32>
    %113 = arith.mulf %0, %112 : vector<1x8xf32>
    %c9_29 = arith.constant 9 : index
    %114 = memref.load %arg2[%c9_29] : memref<10xf32, #tpu.memory_space<smem>>
    %115 = vector.broadcast %114 : f32 to vector<1x8xf32>
    %116 = arith.addf %113, %115 : vector<1x8xf32>
    %cst_30 = arith.constant 0.000000e+00 : f32
    %117 = vector.broadcast %cst_30 : f32 to vector<1x8xf32>
    %118 = arith.maximumf %116, %117 : vector<1x8xf32>
    %c9_31 = arith.constant 9 : index
    %119 = memref.load %arg3[%c9_31] : memref<10xf32, #tpu.memory_space<smem>>
    %120 = vector.broadcast %119 : f32 to vector<1x8xf32>
    %121 = arith.mulf %118, %120 : vector<1x8xf32>
    %122 = arith.addf %110, %121 : vector<1x8xf32>
    %cst_32 = arith.constant 0.000000e+00 : f32
    %123 = vector.broadcast %cst_32 : f32 to vector<1x8xf32>
    %124 = arith.subf %123, %122 : vector<1x8xf32>
    %125 = math.exp %124 : vector<1x8xf32>
    %cst_33 = arith.constant 1.000000e+00 : f32
    %126 = vector.broadcast %cst_33 : f32 to vector<1x8xf32>
    %127 = arith.addf %126, %125 : vector<1x8xf32>
    %cst_34 = arith.constant 1.000000e+00 : f32
    %128 = vector.broadcast %cst_34 : f32 to vector<1x8xf32>
    %129 = arith.divf %128, %127 : vector<1x8xf32>
    %c0_35 = arith.constant 0 : index
    %c0_36 = arith.constant 0 : index
    %130 = vector.load %arg6[%c0_35, %c0_36] : memref<1x8xf32, #tpu.memory_space<vmem>>, vector<1x8xf32>
    tpu.vector_store %arg6[%c0_35, %c0_36], %129 {strides = array<i32>} : memref<1x8xf32, #tpu.memory_space<vmem>>, vector<1x8xf32>,
    return
  }
  func.func @transform_0(%arg0: i32) -> i32 {
    %c0_i32 = arith.constant 0 : i32
    %c0_i32_0 = arith.constant 0 : i32
    return %c0_i32 : i32
  }
  func.func @transform_1(%arg0: i32) -> i32 {
    %c0_i32 = arith.constant 0 : i32
    %c0_i32_0 = arith.constant 0 : i32
    return %c0_i32 : i32
  }
  func.func @transform_2(%arg0: i32) -> i32 {
    %c0_i32 = arith.constant 0 : i32
    %c0_i32_0 = arith.constant 0 : i32
    return %c0_i32 : i32
  }
  func.func @transform_3(%arg0: i32) -> i32 {
    %c0_i32 = arith.constant 0 : i32
    %c0_i32_0 = arith.constant 0 : i32
    return %c0_i32 : i32
  }
  func.func @transform_4(%arg0: i32) -> (i32, i32) {
    %c0_i32 = arith.constant 0 : i32
    %c0_i32_0 = arith.constant 0 : i32
    return %c0_i32, %arg0 : i32, i32
  }
  func.func @transform_5(%arg0: i32) -> (i32, i32) {
    %c0_i32 = arith.constant 0 : i32
    %c0_i32_0 = arith.constant 0 : i32
    return %c0_i32, %arg0 : i32, i32
  }
}

</mosaic_0001>

<bundles_post_ra>
// kernel: tpu_custom_call.1
= control target key start
LH: loop header
LB: loop body
LE: loop exit
PB: predicated region body
PF: predicated region fallthrough
CT: control target
= control target key end

     0   :  { %11 = vsyncpa [#allocation5], 0  ;;  %s377_s0 = inlined_call_operand.vmem [shape: f32[10], index: 0, kind: input, shape index: {}]   ;;  %s378_s1 = inlined_call_operand.vmem [shape: f32[10], index: 1, kind: input, shape index: {}]   ;;  %s379_s2 = inlined_call_operand.vmem [shape: f32[10], index: 2, kind: input, shape index: {}]   ;;  %s380_s3 = inlined_call_operand.<no memory space> [shape: f32[1], index: 3, kind: input, shape index: {}]   ;;  %s381_s4 = inlined_call_operand.vmem [shape: f32[1,8], index: 4, kind: input, shape index: {}]   ;;  %s382_s5 = inlined_call_operand.hbm [shape: f32[1,8], index: 5, kind: output, shape index: {}]  }
   0x1   :  { %12 = vsyncpa [#allocation7], 0  ;;  %s30_s20 = sshll.u32 %s378_s1, 4  ;;  %s31_s20 = int_to_ptr.vmem [resolvable:$true] %s30_s20 }
   0x2   :  { %13 = vsyncpa [#allocation4], 0  ;;  %s20_s23 = sshll.u32 %s377_s0, 4  ;;  %s230_s24 = scalar_lea.vmem %s31_s20, 16  ;;  %s21_s23 = int_to_ptr.vmem [resolvable:$true] %s20_s23 }
   0x3   :  { %p231_p0 = scmp.ne.s32.totalorder %s31_s20, %s230_s24  ;;  %p235_p1 = scmp.lt.s32.totalorder %s31_s20, %s31_s20 }
   0x4   :  { %p236_p2 = scmp.lt.s32.totalorder %s230_s24, %s230_s24 }
   0x6   :  { %p237_p3 = por %p236_p2, %p235_p1 }
   0x8   :  { %p238_p4 = pnand %p237_p3, %p231_p0 }
   0xa   :  { %241 = shalt.err (!%p238_p4)
}
   0xb   :  { %s292_s25 = smov [#allocation6]   ;;  %s242_s26 = scalar_lea.vmem %s21_s23, 16 }
   0xc   :  { %33 = dma.vmem_to_smem %s31_s20, 16, %s292_s25, [#allocation7]  }
   0xd   :  { %p243_p5 = scmp.ne.s32.totalorder %s21_s23, %s242_s26  ;;  %p247_p6 = scmp.lt.s32.totalorder %s21_s23, %s21_s23 }
   0xe   :  { %p248_p7 = scmp.lt.s32.totalorder %s242_s26, %s242_s26 }
  0x10   :  { %p249_p8 = por %p248_p7, %p247_p6 }
  0x12   :  { %p250_p9 = pnand %p249_p8, %p243_p5 }
  0x14   :  { %253 = shalt.err (!%p250_p9)
}
  0x15   :  { %s293_s1 = smov [#allocation3]   ;;  %s40_s28 = sshll.u32 %s379_s2, 4  ;;  %s41_s28 = int_to_ptr.vmem [resolvable:$true] %s40_s28 }
  0x16   :  { %23 = dma.vmem_to_smem %s21_s23, 16, %s293_s1, [#allocation5]  }
  0x17   :  { %s254_s29 = scalar_lea.vmem %s41_s28, 16  ;;  %p259_p11 = scmp.lt.s32.totalorder %s41_s28, %s41_s28 }
  0x18   :  { %p255_p10 = scmp.ne.s32.totalorder %s41_s28, %s254_s29  ;;  %p260_p12 = scmp.lt.s32.totalorder %s254_s29, %s254_s29 }
  0x1a   :  { %p261_p13 = por %p260_p12, %p259_p11 }
  0x1c   :  { %p262_p0 = pnand %p261_p13, %p255_p10 }
  0x1e   :  { %265 = shalt.err (!%p262_p0)
}
  0x1f   :  { %s294_s30 = smov [#allocation8]  }
  0x20   :  { %43 = dma.vmem_to_smem %s41_s28, 16, %s294_s30, [#allocation7]  }
  0x21   :  { %286 = dma.done.wait [#allocation5], 16  }
  0x22   :  { %287 = vsyncadd [#allocation5], 4294967280 }
  0x23   :  { %288 = dma.done.wait [#allocation7], 32  }
  0x24   :  { %289 = vsyncadd [#allocation7], 4294967264 }
  0x25   :  { %57 = sfence }
  0x26   :  { %s61_s6 = sld [smem:[#allocation3]]  ;;  %v338_v0 = vld [vmem:[%s381_s4] sm:$0x1]  ;;  %v60_v10 = vstv %s380_s3  ;;  %s295_s2 = smov [#allocation9]   ;;  %vm177_vm0 = vcmask 57344  }
  0x27   :  { %s64_s7 = sld [smem:[#allocation6]]  ;;  %s185_s10 = sshll.u32 %s295_s2, 4  ;;  %s186_s10 = int_to_ptr.vmem [resolvable:$true] %s185_s10 }
  0x28   :  { %s68_s8 = sld [smem:[#allocation8]]  ;;  %p271_p2 = scmp.lt.s32.totalorder %s186_s10, %s186_s10 }
  0x29   :  { %s195_s9 = sld [smem:[#allocation3 + $0x1]] }
  0x2a   :  { %s196_s11 = sld [smem:[#allocation6 + $0x1]] }
  0x2b   :  { %s340_s12 = sld [smem:[#allocation8 + $0x1]] }
  0x2c   :  { %v62_v1 = vstv %s61_s6  ;;  %s198_s13 = sld [smem:[#allocation3 + $0x2]] }
  0x2d   :  { %v63_v2 = vmul.f32 %v62_v1, %v338_v0  ;;  %v65_v3 = vstv %s64_s7  ;;  %s199_s14 = sld [smem:[#allocation6 + $0x2]] }
  0x2e   :  { %s343_s15 = sld [smem:[#allocation8 + $0x2]]  ;;  %v69_v6 = vstv %s68_s8 }
  0x2f   :  { %v66_v4 = vadd.f32 %v65_v3, %v63_v2  ;;  %v73_v5 = vstv %s195_s9  ;;  %s201_s16 = sld [smem:[#allocation3 + $0x3]] }
  0x30   :  { %v74_v7 = vmul.f32 %v73_v5, %v338_v0  ;;  %v76_v8 = vstv %s196_s11  ;;  %s202_s4 = sld [smem:[#allocation6 + $0x3]]  ;;  %s266_s11 = scalar_lea.vmem %s186_s10, 16 }
  0x31   :  { %v67_v9 = vmax.f32 %v66_v4, 0.0  ;;  %s346_s17 = sld [smem:[#allocation8 + $0x3]]  ;;  %v80_v14 = vstv %s340_s12  ;;  %p267_p1 = scmp.ne.s32.totalorder %s186_s10, %s266_s11 }
  0x32   :  { %v77_v11 = vadd.f32 %v76_v8, %v74_v7  ;;  %v84_v12 = vstv %s198_s13  ;;  %s204_s20 = sld [smem:[#allocation3 + $0x4]]  ;;  %s270_s12 = scalar_lea.vmem %s186_s10, 32 }
  0x33   :  { %v70_v13 = vmul.f32 %v69_v6, %v67_v9  ;;  %v85_v15 = vmul.f32 %v84_v12, %v338_v0  ;;  %v87_v16 = vstv %s199_s14  ;;  %s205_s21 = sld [smem:[#allocation6 + $0x4]]  ;;  %p272_p3 = scmp.lt.s32.totalorder %s270_s12, %s266_s11 }
  0x34   :  { %v78_v17 = vmax.f32 %v77_v11, 0.0  ;;  %s353_s22 = sld [smem:[#allocation8 + $0x4]]  ;;  %v91_v22 = vstv %s343_s15 }
  0x35   :  { %v71_v18 = vadd.f32 %v70_v13, %v60_v10  ;;  %v88_v19 = vadd.f32 %v87_v16, %v85_v15  ;;  %v95_v20 = vstv %s201_s16  ;;  %s207_s23 = sld [smem:[#allocation3 + $0x5]]  ;;  %p273_p4 = por %p272_p3, %p271_p2 }
  0x36   :  { %v81_v21 = vmul.f32 %v80_v14, %v78_v17  ;;  %v96_v23 = vmul.f32 %v95_v20, %v338_v0  ;;  %v98_v24 = vstv %s202_s4  ;;  %s208_s3 = sld [smem:[#allocation6 + $0x5]] }
  0x37   :  { %v89_v25 = vmax.f32 %v88_v19, 0.0  ;;  %s357_s24 = sld [smem:[#allocation8 + $0x5]]  ;;  %v102_v30 = vstv %s346_s17  ;;  %p274_p5 = pnand %p273_p4, %p267_p1 }
  0x38   :  { %v82_v26 = vadd.f32 %v81_v21, %v71_v18  ;;  %v99_v27 = vadd.f32 %v98_v24, %v96_v23  ;;  %v106_v28 = vstv %s204_s20  ;;  %s210_s25 = sld [smem:[#allocation3 + $0x6]] }
  0x39   :  { %v92_v29 = vmul.f32 %v91_v22, %v89_v25  ;;  %v107_v31 = vmul.f32 %v106_v28, %v338_v0  ;;  %v109_v32 = vstv %s205_s21  ;;  %s211_s26 = sld [smem:[#allocation6 + $0x6]] }
  0x3a   :  { %v100_v33 = vmax.f32 %v99_v27, 0.0  ;;  %s361_s1 = sld [smem:[#allocation8 + $0x6]]  ;;  %v113_v38 = vstv %s353_s22 }
  0x3b   :  { %v93_v34 = vadd.f32 %v92_v29, %v82_v26  ;;  %v110_v35 = vadd.f32 %v109_v32, %v107_v31  ;;  %v117_v36 = vstv %s207_s23  ;;  %s213_s0 = sld [smem:[#allocation3 + $0x7]] }
  0x3c   :  { %v103_v37 = vmul.f32 %v102_v30, %v100_v33  ;;  %v118_v39 = vmul.f32 %v117_v36, %v338_v0  ;;  %v120_v40 = vstv %s208_s3  ;;  %s214_s27 = sld [smem:[#allocation6 + $0x7]] }
  0x3d   :  { %v111_v41 = vmax.f32 %v110_v35, 0.0  ;;  %s365_s28 = sld [smem:[#allocation8 + $0x7]]  ;;  %v124_v46 = vstv %s357_s24 }
  0x3e   :  { %v104_v42 = vadd.f32 %v103_v37, %v93_v34  ;;  %v121_v43 = vadd.f32 %v120_v40, %v118_v39  ;;  %v128_v44 = vstv %s210_s25  ;;  %s216_s29 = sld [smem:[#allocation3 + $0x8]] }
  0x3f   :  { %v114_v45 = vmul.f32 %v113_v38, %v111_v41  ;;  %v129_v47 = vmul.f32 %v128_v44, %v338_v0  ;;  %v131_v48 = vstv %s211_s26  ;;  %s217_s30 = sld [smem:[#allocation6 + $0x8]] }
  0x40   :  { %v122_v49 = vmax.f32 %v121_v43, 0.0  ;;  %s218_s6 = sld [smem:[#allocation8 + $0x8]]  ;;  %v135_v54 = vstv %s361_s1 }
  0x41   :  { %v115_v50 = vadd.f32 %v114_v45, %v104_v42  ;;  %v132_v51 = vadd.f32 %v131_v48, %v129_v47  ;;  %v139_v52 = vstv %s213_s0  ;;  %s219_s7 = sld [smem:[#allocation3 + $0x9]] }
  0x42   :  { %v125_v53 = vmul.f32 %v124_v46, %v122_v49  ;;  %v140_v55 = vmul.f32 %v139_v52, %v338_v0  ;;  %v142_v56 = vstv %s214_s27  ;;  %s220_s8 = sld [smem:[#allocation6 + $0x9]] }
  0x43   :  { %v133_v57 = vmax.f32 %v132_v51, 0.0  ;;  %s221_s9 = sld [smem:[#allocation8 + $0x9]]  ;;  %v146_v62 = vstv %s365_s28 }
  0x44   :  { %v126_v58 = vadd.f32 %v125_v53, %v115_v50  ;;  %v143_v59 = vadd.f32 %v142_v56, %v140_v55  ;;  %v150_v60 = vstv %s216_s29 }
  0x45   :  { %v136_v61 = vmul.f32 %v135_v54, %v133_v57  ;;  %v151_v63 = vmul.f32 %v150_v60, %v338_v0  ;;  %v153_v1 = vstv %s217_s30 }
  0x46   :  { %v144_v2 = vmax.f32 %v143_v59, 0.0  ;;  %v157_v7 = vstv %s218_s6 }
  0x47   :  { %v137_v3 = vadd.f32 %v136_v61, %v126_v58  ;;  %v154_v4 = vadd.f32 %v153_v1, %v151_v63  ;;  %v161_v5 = vstv %s219_s7 }
  0x48   :  { %v147_v6 = vmul.f32 %v146_v62, %v144_v2  ;;  %v162_v8 = vmul.f32 %v161_v5, %v338_v0  ;;  %v164_v9 = vstv %s220_s8 }
  0x49   :  { %v155_v10 = vmax.f32 %v154_v4, 0.0  ;;  %v168_v14 = vstv %s221_s9 }
  0x4a   :  { %v148_v11 = vadd.f32 %v147_v6, %v137_v3  ;;  %v165_v12 = vadd.f32 %v164_v9, %v162_v8 }
  0x4b   :  { %v158_v13 = vmul.f32 %v157_v7, %v155_v10 }
  0x4c   :  { %v166_v15 = vmax.f32 %v165_v12, 0.0 }
  0x4d   :  { %v159_v16 = vadd.f32 %v158_v13, %v148_v11 }
  0x4e   :  { %v169_v17 = vmul.f32 %v168_v14, %v166_v15 }
  0x50   :  { %v170_v18 = vadd.f32 %v169_v17, %v159_v16 }
  0x52   :  { %v171_v19 = vsub.f32 0.0, %v170_v18 }
  0x54   :  { %v172_v20 = vmul.f32 1.442695, %v171_v19 }
  0x56   :  { %226 = vpow2.f32 %v172_v20 }
  0x63   :  { %v227_v21 = vpop.eup %226 }
  0x64   :  { %v174_v22 = vadd.f32 1.0, %v227_v21 }
  0x66   :  { %228 = vrcp.f32 %v174_v22 }
  0x73   :  { %v229_v0 = vpop.eup %228 }
  0x74   :  { %178 = vst.msk [vmem:[#allocation9] sm:$0x1] %vm177_vm0, %v229_v0 }
  0x75   :  { %277 = shalt.err (!%p274_p5)
}
  0x76   :  { %188 = dma.vmem_to_hbm [thread:$0]  %s186_s10, 16, %s382_s5, [#allocation4]  }
  0x77   :  { %290 = dma.done.wait [#allocation4], 16  }
  0x78   :  { %291 = vsyncadd [#allocation4], 4294967280 }
  0x79   :  { %192 = vsyncpa [#allocation4], 1 }
  0x7a   :  { %193 = vsyncpa [#allocation5], 1 }
  0x7b   :  { %194 = vsyncpa [#allocation7], 1 }

</bundles_post_ra>
